<compile_context>
chip_gen: v7x
topology: tpu7x:2x2x1
jax: 0.10.0
libtpu: 0.0.40
codegen_flags: <defaults>
</compile_context>

<pallas_src>
import math

import jax
import jax.numpy as jnp
from jax import lax
from jax.experimental import pallas as pl
from jax.experimental.pallas import tpu as pltpu


def _gelu_exact(x):
    # PyTorch nn.GELU() default (erf form), computed in f32 on the VPU.
    return 0.5 * x * (1.0 + lax.erf(x * (1.0 / math.sqrt(2.0))))


def _round_up(n, m):
    return ((n + m - 1) // m) * m


def _vmem_budget_bytes():
    """~75% of physical VMEM; falls back to the smallest generation (v7x, 64 MiB)."""
    cap = 64 * 1024 * 1024
    try:
        info = pltpu.get_tpu_info()
        cap = int(getattr(info, "vmem_capacity_bytes", cap))
    except Exception:
        pass
    return int(cap * 0.75)


def _choose_rows(n_rows, max_tm):
    """Row tile: multiple of 16 (bf16 sublane packing); prefer >=2 tiles for small
    inputs so v7x's two TensorCores both get work on the 'parallel' row axis."""
    n16 = _round_up(max(n_rows, 1), 16)
    if n16 <= max_tm:
        if n16 >= 32:
            tm = _round_up((n16 + 1) // 2, 16)   # two row tiles instead of one
        else:
            tm = n16
    else:
        tm = max_tm
    n_pad = _round_up(n_rows, tm)
    return tm, n_pad


# ---------------------------------------------------------------------------
# Kernels
# ---------------------------------------------------------------------------

def _ffn_kernel_resident(x_ref, w1_ref, w2_ref, o_ref):
    # x_ref:  (TM, D)    bf16 row tile
    # w1_ref: (D, 4D)    full W1^T, resident in VMEM across all row tiles
    # w2_ref: (2D, D)    full W2^T, resident in VMEM across all row tiles
    # o_ref:  (TM, D)    output row tile
    half = w2_ref.shape[0]
    x = x_ref[...]
    # One fused MXU push for both GEGLU halves.
    h = jnp.dot(x, w1_ref[...], preferred_element_type=jnp.float32)   # (TM, 4D) f32
    a = h[:, :half]
    g = h[:, half:]
    ge = a * _gelu_exact(g)                                           # GEGLU in f32
    # dropout: identity in eval/inference mode
    o_ref[...] = jnp.dot(ge.astype(w2_ref.dtype), w2_ref[...],
                         preferred_element_type=jnp.float32).astype(o_ref.dtype)


def _ffn_kernel_tiled_acc(x_ref, w1a_ref, w1g_ref, w2_ref, o_ref, acc_ref):
    # Hidden-tiled fallback with f32 accumulator scratch (non-f32 outputs).
    j = pl.program_id(1)

    @pl.when(j == 0)
    def _():
        acc_ref[...] = jnp.zeros_like(acc_ref)

    x = x_ref[...]
    a = jnp.dot(x, w1a_ref[...], preferred_element_type=jnp.float32)
    g = jnp.dot(x, w1g_ref[...], preferred_element_type=jnp.float32)
    ge = a * _gelu_exact(g)
    acc_ref[...] += jnp.dot(ge.astype(w2_ref.dtype), w2_ref[...],
                            preferred_element_type=jnp.float32)

    @pl.when(j == pl.num_programs(1) - 1)
    def _():
        o_ref[...] = acc_ref[...].astype(o_ref.dtype)


def _ffn_kernel_tiled_f32out(x_ref, w1a_ref, w1g_ref, w2_ref, o_ref):
    # Hidden-tiled fallback accumulating directly into the resident f32 output
    # block (saves the acc scratch + final copy; fewer vst slots on v5e).
    j = pl.program_id(1)

    @pl.when(j == 0)
    def _():
        o_ref[...] = jnp.zeros_like(o_ref)

    x = x_ref[...]
    a = jnp.dot(x, w1a_ref[...], preferred_element_type=jnp.float32)
    g = jnp.dot(x, w1g_ref[...], preferred_element_type=jnp.float32)
    ge = a * _gelu_exact(g)
    o_ref[...] += jnp.dot(ge.astype(w2_ref.dtype), w2_ref[...],
                          preferred_element_type=jnp.float32)


# ---------------------------------------------------------------------------
# Weight prep + wrapper
# ---------------------------------------------------------------------------

def prepare_ffn_weights(w1, w2, compute_dtype=jnp.bfloat16):
    """One-time weight relayout (keep OUTSIDE the per-call hot path).

    w1: (4D, D) torch Linear weight of w_1;  w2: (D, 2D) torch Linear weight of w_2.
    Returns (w1t, w2t): (D, 4D) with columns [a | gate], and (2D, D), in compute_dtype.
    """
    H, D = w1.shape
    assert H % 2 == 0 and w2.shape == (D, H // 2)
    w1t = jnp.asarray(w1, compute_dtype).T          # (D, 4D) — [a-cols | gate-cols]
    w2t = jnp.asarray(w2, compute_dtype).T          # (2D, D)
    return w1t, w2t


def feed_forward_pallas(x, w1t, w2t, *, tile_hidden=512, force_tiled=False):
    """x: [B, T, D]; weights pre-transposed by prepare_ffn_weights (bf16)."""
    B, T, D = x.shape
    H = w1t.shape[1]
    H_half = H // 2
    assert w1t.shape == (D, H)
    assert w2t.shape == (H_half, D)

    compute_dtype = w1t.dtype
    out_dtype = x.dtype
    elt = jnp.dtype(compute_dtype).itemsize
    oelt = jnp.dtype(out_dtype).itemsize

    N = B * T
    budget = _vmem_budget_bytes()

    x2d = x.reshape(N, D).astype(compute_dtype)

    def _pad_rows(arr, n_pad):
        return jnp.pad(arr, ((0, n_pad - N), (0, 0))) if n_pad != N else arr

    # ----------------------- weight-resident fast path -----------------------
    if not force_tiled:
        weight_bytes = 2 * (D * H + H_half * D) * elt          # W1^T + W2^T (2x buffering safety)
        for cand in (512, 256, 128, 64, 32, 16):
            tm, n_pad = _choose_rows(N, cand)
            est = (weight_bytes
                   + 2 * tm * D * elt                           # x tile, double-buffered
                   + 2 * tm * D * oelt                          # out tile, double-buffered
                   + 2 * tm * H * 4)                            # f32 h + geglu intermediates
            if est * 1.1 <= budget:
                vmem_limit = int(min(budget, max(int(est * 1.5), 16 * 1024 * 1024)))
                out2d = pl.pallas_call(
                    _ffn_kernel_resident,
                    out_shape=jax.ShapeDtypeStruct((n_pad, D), out_dtype),
                    grid_spec=pltpu.PrefetchScalarGridSpec(
                        num_scalar_prefetch=0,
                        grid=(n_pad // tm,),
                        in_specs=[
                            pl.BlockSpec((tm, D), lambda i: (i, 0)),       # x rows
                            pl.BlockSpec((D, H), lambda i: (0, 0)),        # W1^T (resident)
                            pl.BlockSpec((H_half, D), lambda i: (0, 0)),   # W2^T (resident)
                        ],
                        out_specs=pl.BlockSpec((tm, D), lambda i: (i, 0)),
                    ),
                    compiler_params=pltpu.CompilerParams(
                        dimension_semantics=("parallel",),
                        vmem_limit_bytes=vmem_limit,
                    ),
                )(_pad_rows(x2d, n_pad), w1t, w2t)
                if n_pad != N:
                    out2d = out2d[:N]
                return out2d.reshape(B, T, D)

    # ----------------------- hidden-tiled fallback path ----------------------
    # Hidden tile over the 2D "half" dimension (MXU-aligned multiple of 128).
    tn = min(tile_hidden, H_half)
    if H_half % tn != 0 or tn % 128 != 0:
        tn = H_half
        for cand in range(min(tile_hidden, H_half), 127, -128):
            if H_half % cand == 0 and cand % 128 == 0:
                tn = cand
                break
    assert H_half % tn == 0, "hidden half-dim must be divisible by the hidden tile"

    f32_out = (jnp.dtype(out_dtype) == jnp.dtype(jnp.float32))

    tm, n_pad, est = None, None, None
    for cand in (1024, 768, 512, 384, 256, 128):
        tm, n_pad = _choose_rows(N, cand)
        est = (2 * (2 * D * tn + tn * D) * elt      # w1a/w1g/w2 tiles, double-buffered
               + 2 * tm * D * elt                   # x tile, double-buffered
               + 2 * tm * D * oelt                  # out tile, double-buffered
               + 3 * tm * tn * 4                    # a/g/ge f32 intermediates
               + (0 if f32_out else tm * D * 4))    # f32 accumulator scratch
        if est * 1.1 <= budget:
            break
    vmem_limit = int(min(budget, max(int(est * 1.5), 16 * 1024 * 1024)))

    n_hidden_tiles = H_half // tn
    grid = (n_pad // tm, n_hidden_tiles)

    in_specs = [
        pl.BlockSpec((tm, D), lambda i, j: (i, 0)),                      # x rows
        pl.BlockSpec((D, tn), lambda i, j: (0, j)),                      # W1^T "a" column tile
        pl.BlockSpec((D, tn), lambda i, j: (0, j + n_hidden_tiles)),     # W1^T "gate" column tile
        pl.BlockSpec((tn, D), lambda i, j: (j, 0)),                      # W2^T row tile
    ]
    out_spec = pl.BlockSpec((tm, D), lambda i, j: (i, 0))

    if f32_out:
        kernel = _ffn_kernel_tiled_f32out
        scratch = []
    else:
        kernel = _ffn_kernel_tiled_acc
        scratch = [pltpu.VMEM((tm, D), jnp.float32)]

    out2d = pl.pallas_call(
        kernel,
        out_shape=jax.ShapeDtypeStruct((n_pad, D), out_dtype),
        grid_spec=pltpu.PrefetchScalarGridSpec(
            num_scalar_prefetch=0,
            grid=grid,
            in_specs=in_specs,
            out_specs=out_spec,
            scratch_shapes=scratch,
        ),
        compiler_params=pltpu.CompilerParams(
            dimension_semantics=("parallel", "arbitrary"),
            vmem_limit_bytes=vmem_limit,
        ),
    )(_pad_rows(x2d, n_pad), w1t, w1t, w2t)   # w1t passed twice: a- / gate-column views

    if n_pad != N:
        out2d = out2d[:N]
    return out2d.reshape(B, T, D)


# ---------------------------------------------------------------------------
# References + demo
# ---------------------------------------------------------------------------

def _reference_bf16(x, w1t, w2t):
    """Same numerics as the kernel (bf16 operands, f32 accumulation)."""
    H_half = w2t.shape[0]
    xb = x.reshape(-1, x.shape[-1]).astype(w1t.dtype)
    h = jnp.dot(xb, w1t, preferred_element_type=jnp.float32)
    a, g = h[:, :H_half], h[:, H_half:]
    ge = a * _gelu_exact(g)
    y = jnp.dot(ge.astype(w2t.dtype), w2t, preferred_element_type=jnp.float32)
    return y.reshape(x.shape).astype(x.dtype)


def _reference_f32(x, w1, w2):
    """Full-f32 PyTorch-semantics reference (sanity check, loose tolerance vs bf16)."""
    h = jnp.einsum("btd,hd->bth", x, w1)
    half = h.shape[-1] // 2
    a, g = h[..., :half], h[..., half:]
    return jnp.einsum("bth,dh->btd", a * _gelu_exact(g), w2)


# TODO(synk): nn.Dropout is identity at inference; training-mode RNG dropout is not implemented.

if __name__ == "__main__":
    # Small, lane-friendly shapes: B=2, T=8, d_model=128.
    B, T, D = 2, 8, 128
    H = 4 * D

    key = jax.random.PRNGKey(0)
    kx, k1, k2 = jax.random.split(key, 3)

    x = jax.random.normal(kx, (B, T, D), dtype=jnp.float32)
    # Deterministic Linear-style init (uniform +/- 1/sqrt(fan_in)), torch weight layout (out, in).
    b1 = 1.0 / math.sqrt(D)
    b2 = 1.0 / math.sqrt(H // 2)
    w1 = jax.random.uniform(k1, (H, D), minval=-b1, maxval=b1, dtype=jnp.float32)
    w2 = jax.random.uniform(k2, (D, H // 2), minval=-b2, maxval=b2, dtype=jnp.float32)

    # One-time relayout (outside the per-call hot path).
    w1t, w2t = prepare_ffn_weights(w1, w2, compute_dtype=jnp.bfloat16)

    # Weight-resident fast path (default for this size).
    out = feed_forward_pallas(x, w1t, w2t)
    out = jax.block_until_ready(out)
    assert out.shape == (B, T, D)

    # Hidden-tiled fallback path (forced) — validates the large-D code path too.
    out_tiled = feed_forward_pallas(x, w1t, w2t, force_tiled=True)
    out_tiled = jax.block_until_ready(out_tiled)

    # Exact-numerics reference (same bf16 operands / f32 accumulation path).
    ref_bf16 = _reference_bf16(x, w1t, w2t)
    assert jnp.allclose(out, ref_bf16, atol=2e-3, rtol=2e-3), "resident path mismatch vs bf16 reference"
    assert jnp.allclose(out_tiled, ref_bf16, atol=2e-3, rtol=2e-3), "tiled path mismatch vs bf16 reference"

    # Sanity vs full-f32 PyTorch semantics (loose tolerance due to bf16 operands).
    ref_f32 = _reference_f32(x, w1, w2)
    assert jnp.allclose(out, ref_f32, atol=5e-2, rtol=5e-2), "mismatch vs f32 reference"

    print("KERNEL_OK")
</pallas_src>

<mosaic_0001>
module attributes {stable_mosaic.version = 11 : i64} {
  func.func @_ffn_kernel_resident(%arg0: i32, %arg1: memref<16x128xbf16, #tpu.memory_space<vmem>>, %arg2: memref<128x512xbf16, #tpu.memory_space<vmem>>, %arg3: memref<256x128xbf16, #tpu.memory_space<vmem>>, %arg4: memref<16x128xf32, #tpu.memory_space<vmem>>) attributes {dimension_semantics = [#tpu.dimension_semantics<parallel>], iteration_bounds = array<i64: 1>, scalar_prefetch = 0 : i64, scratch_operands = 0 : i64, tpu.core_type = #tpu.core_type<tc>, window_params = [{transform_indices = @transform_0, window_bounds = array<i64: 16, 128>}, {pipeline_mode = #tpu.pipeline_mode<synchronous>, transform_indices = @transform_1, window_bounds = array<i64: 128, 512>}, {pipeline_mode = #tpu.pipeline_mode<synchronous>, transform_indices = @transform_2, window_bounds = array<i64: 256, 128>}, {transform_indices = @transform_3, window_bounds = array<i64: 16, 128>}]} {
    %c0 = arith.constant 0 : index
    %c0_0 = arith.constant 0 : index
    %0 = vector.load %arg1[%c0, %c0_0] : memref<16x128xbf16, #tpu.memory_space<vmem>>, vector<16x128xbf16>
    %c0_1 = arith.constant 0 : index
    %c0_2 = arith.constant 0 : index
    %1 = vector.load %arg2[%c0_1, %c0_2] : memref<128x512xbf16, #tpu.memory_space<vmem>>, vector<128x512xbf16>
    %cst = arith.constant dense<0.000000e+00> : vector<16x512xf32>
    %2 = tpu.matmul %0, %1, %cst {dimension_numbers = #tpu.dot_dimension_numbers<[1], [0], [0], [1], [0, 0, 1, 1], [], []>} : vector<16x128xbf16>, vector<128x512xbf16>, vector<16x512xf32> -> vector<16x512xf32>
    %3 = vector.extract_strided_slice %2 {offsets = [0, 0], sizes = [16, 256], strides = [1, 1]} : vector<16x512xf32> to vector<16x256xf32>
    %4 = vector.extract_strided_slice %2 {offsets = [0, 256], sizes = [16, 256], strides = [1, 1]} : vector<16x512xf32> to vector<16x256xf32>
    %cst_3 = arith.constant 5.000000e-01 : f32
    %5 = vector.broadcast %cst_3 : f32 to vector<16x256xf32>
    %6 = arith.mulf %5, %4 : vector<16x256xf32>
    %cst_4 = arith.constant 0.707106769 : f32
    %7 = vector.broadcast %cst_4 : f32 to vector<16x256xf32>
    %8 = arith.mulf %4, %7 : vector<16x256xf32>
    %9 = math.erf %8 : vector<16x256xf32>
    %cst_5 = arith.constant 1.000000e+00 : f32
    %10 = vector.broadcast %cst_5 : f32 to vector<16x256xf32>
    %11 = arith.addf %10, %9 : vector<16x256xf32>
    %12 = arith.mulf %6, %11 : vector<16x256xf32>
    %13 = arith.mulf %3, %12 : vector<16x256xf32>
    %14 = arith.truncf %13 : vector<16x256xf32> to vector<16x256xbf16>
    %c0_6 = arith.constant 0 : index
    %c0_7 = arith.constant 0 : index
    %15 = vector.load %arg3[%c0_6, %c0_7] : memref<256x128xbf16, #tpu.memory_space<vmem>>, vector<256x128xbf16>
    %cst_8 = arith.constant dense<0.000000e+00> : vector<16x128xf32>
    %16 = tpu.matmul %14, %15, %cst_8 {dimension_numbers = #tpu.dot_dimension_numbers<[1], [0], [0], [1], [0, 0, 1, 1], [], []>} : vector<16x256xbf16>, vector<256x128xbf16>, vector<16x128xf32> -> vector<16x128xf32>
    %c0_9 = arith.constant 0 : index
    %c0_10 = arith.constant 0 : index
    %17 = vector.load %arg4[%c0_9, %c0_10] : memref<16x128xf32, #tpu.memory_space<vmem>>, vector<16x128xf32>
    tpu.vector_store %arg4[%c0_9, %c0_10], %16 {strides = array<i32>} : memref<16x128xf32, #tpu.memory_space<vmem>>, vector<16x128xf32>,
    return
  }
  func.func @transform_0(%arg0: i32) -> (i32, i32) {
    %c0_i32 = arith.constant 0 : i32
    %c0_i32_0 = arith.constant 0 : i32
    return %arg0, %c0_i32 : i32, i32
  }
  func.func @transform_1(%arg0: i32) -> (i32, i32) {
    %c0_i32 = arith.constant 0 : i32
    %c0_i32_0 = arith.constant 0 : i32
    %c0_i32_1 = arith.constant 0 : i32
    return %c0_i32, %c0_i32_0 : i32, i32
  }
  func.func @transform_2(%arg0: i32) -> (i32, i32) {
    %c0_i32 = arith.constant 0 : i32
    %c0_i32_0 = arith.constant 0 : i32
    %c0_i32_1 = arith.constant 0 : i32
    return %c0_i32, %c0_i32_0 : i32, i32
  }
  func.func @transform_3(%arg0: i32) -> (i32, i32) {
    %c0_i32 = arith.constant 0 : i32
    %c0_i32_0 = arith.constant 0 : i32
    return %arg0, %c0_i32 : i32, i32
  }
}

</mosaic_0001>

<bundles_post_ra>
// kernel: tpu_custom_call.1
= control target key start
LH: loop header
LB: loop body
LE: loop exit
PB: predicated region body
PF: predicated region fallthrough
CT: control target
= control target key end

     0   :  { %8 = vsyncpa [#allocation3], 0  ;;  %s886_s0 = inlined_call_operand.hbm [shape: bf16[16,128], index: 0, kind: input, shape index: {}]   ;;  %s887_s1 = inlined_call_operand.hbm [shape: bf16[128,512], index: 1, kind: input, shape index: {}]   ;;  %s888_s2 = inlined_call_operand.hbm [shape: bf16[256,128], index: 2, kind: input, shape index: {}]   ;;  %s889_s3 = inlined_call_operand.hbm [shape: f32[16,128], index: 3, kind: output, shape index: {}]  }
   0x1   :  { %9 = vsyncpa [#allocation6], 0 }
   0x2   :  { %10 = vsyncpa [#allocation4], 0  ;;  %s807_s12 = smov [#allocation5]   ;;  %s713_s16 = scalar_lea.hbm %s887_s1, 4096 }
   0x3   :  { %s28_s13 = sshll.u32 %s807_s12, 4  ;;  %p714_p0 = scmp.ne.s32.totalorder %s887_s1, %s713_s16  ;;  %s29_s13 = int_to_ptr.vmem [resolvable:$true] %s28_s13 }
   0x4   :  { %p717_p1 = scmp.lt.u32.totalorder %s713_s16, %s887_s1 }
   0x6   :  { %p719_p2 = pnand %p717_p1, %p714_p0 }
   0x8   :  { %722 = shalt.err (!%p719_p2)
}
   0x9   :  { %s723_s21 = scalar_lea.vmem %s29_s13, 4096  ;;  %p728_p4 = scmp.lt.s32.totalorder %s29_s13, %s29_s13 }
   0xa   :  { %p724_p3 = scmp.ne.s32.totalorder %s29_s13, %s723_s21  ;;  %p729_p5 = scmp.lt.s32.totalorder %s723_s21, %s723_s21 }
   0xc   :  { %p730_p6 = por %p729_p5, %p728_p4 }
   0xe   :  { %p731_p7 = pnand %p730_p6, %p724_p3 }
  0x10   :  { %734 = shalt.err (!%p731_p7)
}
  0x11   :  { %s808_s22 = smov 256   ;;  %s809_s23 = smov 16  }
  0x12   :  { %34 = dma.hbm_to_vmem [thread:$0]  %s887_s1, 4096, %s29_s13, [#allocation6], %s808_s22, %s808_s22, %s809_s23  }
  0x13   :  { %s810_s26 = smov [#allocation2]   ;;  %s735_s30 = scalar_lea.hbm %s886_s0, 128 }
  0x14   :  { %s16_s27 = sshll.u32 %s810_s26, 4  ;;  %p736_p8 = scmp.ne.s32.totalorder %s886_s0, %s735_s30  ;;  %s17_s27 = int_to_ptr.vmem [resolvable:$true] %s16_s27 }
  0x15   :  { %p739_p9 = scmp.lt.u32.totalorder %s735_s30, %s886_s0 }
  0x17   :  { %p741_p10 = pnand %p739_p9, %p736_p8 }
  0x19   :  { %744 = shalt.err (!%p741_p10)
}
  0x1a   :  { %s745_s8 = scalar_lea.vmem %s17_s27, 128  ;;  %p750_p12 = scmp.lt.s32.totalorder %s17_s27, %s17_s27 }
  0x1b   :  { %p746_p11 = scmp.ne.s32.totalorder %s17_s27, %s745_s8  ;;  %p751_p13 = scmp.lt.s32.totalorder %s745_s8, %s745_s8 }
  0x1d   :  { %p752_p0 = por %p751_p13, %p750_p12 }
  0x1f   :  { %p753_p1 = pnand %p752_p0, %p746_p11 }
  0x21   :  { %756 = shalt.err (!%p753_p1)
}
  0x22   :  { %s811_s1 = smov 64   ;;  %s812_s9 = smov 4  }
  0x23   :  { %22 = dma.hbm_to_vmem [thread:$0]  %s886_s0, 128, %s17_s27, [#allocation3], %s811_s1, %s811_s1, %s812_s9  }
  0x24   :  { %s813_s12 = smov [#allocation7]   ;;  %s757_s16 = scalar_lea.hbm %s888_s2, 2048 }
  0x25   :  { %s40_s13 = sshll.u32 %s813_s12, 4  ;;  %p758_p2 = scmp.ne.s32.totalorder %s888_s2, %s757_s16  ;;  %s41_s13 = int_to_ptr.vmem [resolvable:$true] %s40_s13 }
  0x26   :  { %p761_p3 = scmp.lt.u32.totalorder %s757_s16, %s888_s2 }
  0x28   :  { %p763_p4 = pnand %p761_p3, %p758_p2 }
  0x2a   :  { %766 = shalt.err (!%p763_p4)
}
  0x2b   :  { %s767_s21 = scalar_lea.vmem %s41_s13, 2048  ;;  %p772_p6 = scmp.lt.s32.totalorder %s41_s13, %s41_s13 }
  0x2c   :  { %p768_p5 = scmp.ne.s32.totalorder %s41_s13, %s767_s21  ;;  %p773_p7 = scmp.lt.s32.totalorder %s767_s21, %s767_s21 }
  0x2e   :  { %p774_p8 = por %p773_p7, %p772_p6 }
  0x30   :  { %p775_p9 = pnand %p774_p8, %p768_p5 }
  0x32   :  { %778 = shalt.err (!%p775_p9)
}
  0x33   :  { %46 = dma.hbm_to_vmem [thread:$0]  %s888_s2, 2048, %s41_s13, [#allocation6], %s811_s1, %s811_s1, %s812_s9  }
  0x34   :  { %801 = dma.done.wait [#allocation3], 128  }
  0x35   :  { %802 = vsyncadd [#allocation3], 4294967168 }
  0x36   :  { %803 = dma.done.wait [#allocation6], 6144  }
  0x37   :  { %804 = vsyncadd [#allocation6], 4294961152  ;;  %v814_v0 = vmov 0   ;;  %v640_v1 = vld [vmem:[#allocation5 + $0xc] ss:$16 sps:$4 sm:$0xff]   ;;  %v689_v34 = vld [vmem:[#allocation7 + $0x40] sm:$0xff]  }
  0x38   :  { %332 = vmatprep.mubr.bf16.mxu1 %v814_v0  ;;  %289 = vmatprep.mubr.bf16.mxu0 %v814_v0  ;;  %v642_v2 = vld [vmem:[#allocation5 + $0x8] ss:$16 sps:$4 sm:$0xff]   ;;  %v643_v3 = vld [vmem:[#allocation5 + $0x2c] ss:$16 sps:$4 sm:$0xff]   ;;  %v652_v6 = vld [vmem:[#allocation5 + $0x4] ss:$16 sps:$4 sm:$0xff]  }
  0x39   :  { %300 = vmatprep.subr.bf16.mxu1 %v640_v1  ;;  %v645_v4 = vld [vmem:[#allocation5 + $0x28] ss:$16 sps:$4 sm:$0xff]   ;;  %v646_v5 = vld [vmem:[#allocation5 + $0x4c] ss:$16 sps:$4 sm:$0xff]   ;;  %v654_v7 = vld [vmem:[#allocation5] ss:$16 sps:$4 sm:$0xff]   ;;  %257 = vmatprep.subr.bf16.mxu0 %v652_v6 }
  0x3a   :  { %301 = vmatpush1.bf16.msra.mxu1 %v642_v2  ;;  %v648_v8 = vld [vmem:[#allocation5 + $0x48] ss:$16 sps:$4 sm:$0xff]   ;;  %v649_v9 = vld [vmem:[#allocation5 + $0x6c] ss:$16 sps:$4 sm:$0xff]   ;;  %v658_v10 = vld [vmem:[#allocation5 + $0x24] ss:$16 sps:$4 sm:$0xff]   ;;  %258 = vmatpush1.bf16.msra.mxu0 %v654_v7 }
  0x3b   :  { %302 = vmatprep.subr.bf16.mxu1 %v643_v3  ;;  %v660_v11 = vld [vmem:[#allocation5 + $0x20] ss:$16 sps:$4 sm:$0xff]   ;;  %259 = vmatprep.subr.bf16.mxu0 %v658_v10  ;;  %v651_v12 = vld [vmem:[#allocation5 + $0x68] ss:$16 sps:$4 sm:$0xff]   ;;  %v664_v13 = vld [vmem:[#allocation5 + $0x44] ss:$16 sps:$4 sm:$0xff]  }
  0x3c   :  { %v655_v14 = vld [vmem:[#allocation5 + $0x8c] ss:$16 sps:$4 sm:$0xff]   ;;  %v666_v15 = vld [vmem:[#allocation5 + $0x40] ss:$16 sps:$4 sm:$0xff]   ;;  %v670_v16 = vld [vmem:[#allocation5 + $0x64] ss:$16 sps:$4 sm:$0xff]  }
  0x3d   :  { %v657_v17 = vld [vmem:[#allocation5 + $0x88] ss:$16 sps:$4 sm:$0xff]   ;;  %v661_v18 = vld [vmem:[#allocation5 + $0xac] ss:$16 sps:$4 sm:$0xff]   ;;  %v672_v19 = vld [vmem:[#allocation5 + $0x60] ss:$16 sps:$4 sm:$0xff]  }
  0x3e   :  { %303 = vmatpush1.bf16.msra.mxu1 %v645_v4  ;;  %260 = vmatpush1.bf16.msra.mxu0 %v660_v11  ;;  %v676_v20 = vld [vmem:[#allocation5 + $0x84] ss:$16 sps:$4 sm:$0xff]   ;;  %v663_v21 = vld [vmem:[#allocation5 + $0xa8] ss:$16 sps:$4 sm:$0xff]   ;;  %v667_v22 = vld [vmem:[#allocation5 + $0xcc] ss:$16 sps:$4 sm:$0xff]  }
  0x3f   :  { %304 = vmatprep.subr.bf16.mxu1 %v646_v5  ;;  %261 = vmatprep.subr.bf16.mxu0 %v664_v13  ;;  %v678_v23 = vld [vmem:[#allocation5 + $0x80] ss:$16 sps:$4 sm:$0xff]   ;;  %v680_v24 = vld [vmem:[#allocation5 + $0xa4] ss:$16 sps:$4 sm:$0xff]   ;;  %v669_v25 = vld [vmem:[#allocation5 + $0xc8] ss:$16 sps:$4 sm:$0xff]  }
  0x40   :  { %v673_v26 = vld [vmem:[#allocation5 + $0xec] ss:$16 sps:$4 sm:$0xff]   ;;  %v675_v27 = vld [vmem:[#allocation5 + $0xe8] ss:$16 sps:$4 sm:$0xff]   ;;  %v682_v28 = vld [vmem:[#allocation5 + $0xa0] ss:$16 sps:$4 sm:$0xff]  }
  0x41   :  { %v683_v29 = vld [vmem:[#allocation5 + $0xc4] ss:$16 sps:$4 sm:$0xff]   ;;  %v685_v30 = vld [vmem:[#allocation5 + $0xc0] ss:$16 sps:$4 sm:$0xff]   ;;  %v679_v31 = vld [vmem:[#allocation2] sm:$0xff]   ;;  %s815_s2 = smov [#allocation8]  }
  0x42   :  { %305 = vmatpush1.bf16.msra.mxu1 %v648_v8  ;;  %262 = vmatpush1.bf16.msra.mxu0 %v666_v15  ;;  %v686_v32 = vld [vmem:[#allocation5 + $0xe4] ss:$16 sps:$4 sm:$0xff]   ;;  %v688_v33 = vld [vmem:[#allocation5 + $0xe0] ss:$16 sps:$4 sm:$0xff]   ;;  %v691_v36 = vld [vmem:[#allocation7 + $0x48] sm:$0xff]   ;;  %s545_s23 = sshll.u32 %s815_s2, 4  ;;  %s546_s23 = int_to_ptr.vmem [resolvable:$true] %s545_s23 }
  0x43   :  { %306 = vmatprep.subr.bf16.mxu1 %v649_v9  ;;  %263 = vmatprep.subr.bf16.mxu0 %v670_v16  ;;  %v690_v35 = vld [vmem:[#allocation7] sm:$0xff]   ;;  %v692_v37 = vld [vmem:[#allocation7 + $0x8] sm:$0xff]   ;;  %v693_v38 = vld [vmem:[#allocation7 + $0x50] sm:$0xff]   ;;  %s779_s24 = scalar_lea.vmem %s546_s23, 256  ;;  %p784_p11 = scmp.lt.s32.totalorder %s546_s23, %s546_s23 }
  0x44   :  { %v694_v39 = vld [vmem:[#allocation7 + $0x10] sm:$0xff]   ;;  %v695_v40 = vld [vmem:[#allocation7 + $0x58] sm:$0xff]   ;;  %v697_v42 = vld [vmem:[#allocation7 + $0x60] sm:$0xff]   ;;  %p780_p10 = scmp.ne.s32.totalorder %s546_s23, %s779_s24  ;;  %p785_p12 = scmp.lt.s32.totalorder %s779_s24, %s779_s24 }
  0x45   :  { %v696_v41 = vld [vmem:[#allocation7 + $0x18] sm:$0xff]   ;;  %v698_v43 = vld [vmem:[#allocation7 + $0x20] sm:$0xff]   ;;  %v699_v44 = vld [vmem:[#allocation7 + $0x68] sm:$0xff]  }
  0x46   :  { %307 = vmatpush1.bf16.msra.mxu1 %v651_v12  ;;  %264 = vmatpush1.bf16.msra.mxu0 %v672_v19  ;;  %v700_v45 = vld [vmem:[#allocation7 + $0x28] sm:$0xff]   ;;  %v701_v46 = vld [vmem:[#allocation7 + $0x70] sm:$0xff]   ;;  %v703_v48 = vld [vmem:[#allocation7 + $0x78] sm:$0xff]   ;;  %p786_p13 = por %p785_p12, %p784_p11 }
  0x47   :  { %308 = vmatprep.subr.bf16.mxu1 %v655_v14  ;;  %265 = vmatprep.subr.bf16.mxu0 %v676_v20  ;;  %v702_v47 = vld [vmem:[#allocation7 + $0x30] sm:$0xff]   ;;  %v704_v49 = vld [vmem:[#allocation7 + $0x38] sm:$0xff]  }
  0x48   :  { %p787_p0 = pnand %p786_p13, %p780_p10 }
  0x4a   :  { %309 = vmatpush1.bf16.msra.mxu1 %v657_v17  ;;  %266 = vmatpush1.bf16.msra.mxu0 %v678_v23 }
  0x4b   :  { %310 = vmatprep.subr.bf16.mxu1 %v661_v18  ;;  %267 = vmatprep.subr.bf16.mxu0 %v680_v24 }
  0x4e   :  { %311 = vmatpush1.bf16.msra.mxu1 %v663_v21  ;;  %268 = vmatpush1.bf16.msra.mxu0 %v682_v28 }
  0x4f   :  { %312 = vmatprep.subr.bf16.mxu1 %v667_v22  ;;  %269 = vmatprep.subr.bf16.mxu0 %v683_v29 }
  0x52   :  { %313 = vmatpush1.bf16.msra.mxu1 %v669_v25  ;;  %270 = vmatpush1.bf16.msra.mxu0 %v685_v30 }
  0x53   :  { %314 = vmatprep.subr.bf16.mxu1 %v673_v26  ;;  %271 = vmatprep.subr.bf16.mxu0 %v686_v32 }
  0x56   :  { %315 = vmatpush1.bf16.msra.mxu1 %v675_v27  ;;  %272 = vmatpush1.bf16.msra.mxu0 %v688_v33 }
  0x57   :  { %607 = vmatprep.subr.bf16.mxu0 %v689_v34 }
  0x59   :  { %333 = vmatmul.mubr.bf16.vlgmr.msra.gmra.mrb[0].mxu1 %v679_v31  ;;  %290 = vmatmul.mubr.bf16.vlgmr.msra.gmra.mrb[0].mxu0 %v679_v31 }
  0x5a   :  { %608 = vmatpush3.bf16.msra.mxu0 %v690_v35 }
  0x5b   :  { %609 = vmatprep.subr.bf16.mxu0 %v691_v36 }
  0x5e   :  { %610 = vmatpush3.bf16.msra.mxu0 %v692_v37 }
  0x5f   :  { %611 = vmatprep.subr.bf16.mxu0 %v693_v38 }
  0x62   :  { %612 = vmatpush3.bf16.msra.mxu0 %v694_v39 }
  0x63   :  { %613 = vmatprep.subr.bf16.mxu0 %v695_v40 }
  0x66   :  { %614 = vmatpush3.bf16.msra.mxu0 %v696_v41 }
  0x67   :  { %615 = vmatprep.subr.bf16.mxu0 %v697_v42 }
  0x6a   :  { %616 = vmatpush3.bf16.msra.mxu0 %v698_v43 }
  0x6b   :  { %617 = vmatprep.subr.bf16.mxu0 %v699_v44 }
  0x6e   :  { %618 = vmatpush3.bf16.msra.mxu0 %v700_v45 }
  0x6f   :  { %619 = vmatprep.subr.bf16.mxu0 %v701_v46 }
  0x72   :  { %620 = vmatpush3.bf16.msra.mxu0 %v702_v47 }
  0x73   :  { %621 = vmatprep.subr.bf16.mxu0 %v703_v48 }
  0x76   :  { %622 = vmatpush3.bf16.msra.mxu0 %v704_v49 }
 0x12c   :  { %v334_v50 = vpop.f32.mrb[0].mxu1  ;;  %v291_v58 = vpop.f32.mrb[0].mxu0 }
 0x12d   :  { %v347_v51 = vmul.f32 0.70710677, %v334_v50  ;;  %v336_v52 = vpop.f32.mrb[1].mxu1  ;;  %v293_v59 = vpop.f32.mrb[1].mxu0  ;;  %v343_v0 = vmul.f32 0.5, %v334_v50 }
 0x12e   :  { %v348_v53 = vmul.f32 0.70710677, %v336_v52  ;;  %v338_v54 = vpop.f32.mrb[2].mxu1  ;;  %v295_v60 = vpop.f32.mrb[2].mxu0  ;;  %v344_v3 = vmul.f32 0.5, %v336_v52 }
 0x12f   :  { %705 = verf.f32 %v347_v51  ;;  %v349_v55 = vmul.f32 0.70710677, %v338_v54  ;;  %v340_v56 = vpop.f32.mrb[3].mxu1  ;;  %v297_v61 = vpop.f32.mrb[3].mxu0  ;;  %v345_v6 = vmul.f32 0.5, %v338_v54 }
 0x130   :  { %707 = verf.f32 %v348_v53  ;;  %v350_v57 = vmul.f32 0.70710677, %v340_v56  ;;  %v346_v9 = vmul.f32 0.5, %v340_v56 }
 0x131   :  { %709 = verf.f32 %v349_v55 }
 0x132   :  { %711 = verf.f32 %v350_v57 }
 0x139   :  { %v706_v62 = vpop.eup %705 }
 0x13a   :  { %v708_v63 = vpop.eup %707  ;;  %v355_v1 = vadd.f32 1.0, %v706_v62 }
 0x13b   :  { %v710_v2 = vpop.eup %709  ;;  %v356_v4 = vadd.f32 1.0, %v708_v63 }
 0x13c   :  { %v712_v5 = vpop.eup %711  ;;  %v359_v7 = vmul.f32 %v355_v1, %v343_v0  ;;  %v357_v8 = vadd.f32 1.0, %v710_v2 }
 0x13d   :  { %v358_v10 = vadd.f32 1.0, %v712_v5  ;;  %v360_v11 = vmul.f32 %v356_v4, %v344_v3 }
 0x13e   :  { %v363_v12 = vmul.f32 %v359_v7, %v291_v58  ;;  %v361_v13 = vmul.f32 %v357_v8, %v345_v6 }
 0x13f   :  { %v364_v14 = vmul.f32 %v360_v11, %v293_v59  ;;  %v362_v15 = vmul.f32 %v358_v10, %v346_v9 }
 0x140   :  { %v365_v16 = vmul.f32 %v361_v13, %v295_v60 }
 0x141   :  { %v366_v17 = vmul.f32 %v362_v15, %v297_v61 }
 0x142   :  { %v367_v18 = vpack.c.bf16 %v365_v16, %v363_v12 }
 0x143   :  { %v368_v19 = vpack.c.bf16 %v366_v17, %v364_v14 }
 0x145   :  { %529 = vmatprep.mubr.bf16.mxu0 %v368_v19 }
 0x146   :  { %530 = vmatmul.mubr.bf16.vlgmr.msra.gmra.mrb[4].mxu0 %v367_v18 }
 0x219   :  { %v623_v20 = vpop.f32.mrb[4].mxu0 }
 0x21a   :  { %v624_v21 = vpop.f32.mrb[5].mxu0 }
 0x21b   :  { %v625_v22 = vadd.f32 %v624_v21, %v623_v20  ;;  %v626_v23 = vpop.f32.mrb[6].mxu0 }
 0x21c   :  { %v627_v24 = vpop.f32.mrb[7].mxu0 }
 0x21d   :  { %538 = vst [vmem:[#allocation8] sm:$0xff] %v625_v22  ;;  %v628_v25 = vadd.f32 %v627_v24, %v626_v23 }
 0x21f   :  { %539 = vst [vmem:[#allocation8 + $0x8] sm:$0xff] %v628_v25 }
 0x220   :  { %790 = shalt.err (!%p787_p0)
}
 0x221   :  { %s791_s27 = scalar_lea.hbm %s889_s3, 256 }
 0x222   :  { %p792_p1 = scmp.ne.s32.totalorder %s889_s3, %s791_s27  ;;  %p795_p2 = scmp.lt.u32.totalorder %s791_s27, %s889_s3 }
 0x224   :  { %p797_p3 = pnand %p795_p2, %p792_p1 }
 0x226   :  { %800 = shalt.err (!%p797_p3)
}
 0x227   :  { %s816_s5 = smov 128   ;;  %s817_s6 = smov 8  }
 0x228   :  { %551 = dma.vmem_to_hbm [thread:$0]  %s546_s23, 256, %s889_s3, [#allocation4], %s816_s5, %s816_s5, %s817_s6  }
 0x229   :  { %805 = dma.done.wait [#allocation4], 256  }
 0x22a   :  { %806 = vsyncadd [#allocation4], 4294967040 }
 0x22b   :  { %555 = vsyncpa [#allocation3], 1 }
 0x22c   :  { %556 = vsyncpa [#allocation6], 1 }
 0x22d   :  { %557 = vsyncpa [#allocation4], 1 }

</bundles_post_ra>
